<compile_context>
chip_gen: v7x
topology: tpu7x:2x2x1
jax: 0.10.0
libtpu: 0.0.40
codegen_flags: <defaults>
</compile_context>

<pallas_src>
import math

import jax
import jax.numpy as jnp
from jax.experimental import pallas as pl
from jax.experimental.pallas import tpu as pltpu


# ----------------------------------------------------------------------------
# Pallas kernel: fused [gather pe rows] -> SiLU MLP
#   out[b] = SiLU(pe[ts[b]] @ W1 + b1) @ W2 + b2
# ----------------------------------------------------------------------------
def _timestep_embed_kernel(ts_ref,          # scalar prefetch: (N,) int32 in SMEM
                           pe_hbm,          # (max_len, D) raw ref (pl.ANY)
                           w_ref,           # (2, D, D) stacked weights, VMEM
                           b_ref,           # (2, 1, D) stacked biases, VMEM
                           o_ref,           # (N, D) output tile
                           x_buf, dma_sems):  # scratch: VMEM (N, D), DMA sems (N,)
    n_rows = x_buf.shape[0]

    # ---- Fused gather: DMA the N requested pe rows straight from HBM into VMEM.
    # All SMEM index reads happen before any .wait(); every row-DMA is in flight at once.
    copies = []
    for b in range(n_rows):                                 # N is small & static -> unrolled
        row = ts_ref[b]
        cp = pltpu.make_async_copy(
            pe_hbm.at[pl.ds(row, 1), :],                    # (1, D) source row in HBM
            x_buf.at[pl.ds(b, 1), :],                       # (1, D) dest row in VMEM
            dma_sems.at[b],
        )
        cp.start()
        copies.append(cp)
    for cp in copies:
        cp.wait()

    x = x_buf[...]                                          # (N, D) f32

    w = w_ref[...]                                          # (2, D, D)
    bias = b_ref[...]                                       # (2, 1, D)

    # Linear 1 (MXU, f32 accumulate) + bias
    h = jnp.dot(x, w[0], preferred_element_type=jnp.float32) + bias[0]
    # SiLU in f32 (exp lowers to the EUP slot)
    h = h * jax.nn.sigmoid(h)
    # Linear 2 (MXU, f32 accumulate) + bias
    o = jnp.dot(h, w[1], preferred_element_type=jnp.float32) + bias[1]

    o_ref[...] = o.astype(o_ref.dtype)


def time_embed_fused(timesteps_flat, pe, w_stack, b_stack):
    """timesteps_flat: (N,) int32; pe: (max_len, D) f32;
    w_stack: (2, D, D); b_stack: (2, 1, D).
    Returns (N, D) f32 = SiLU-MLP(pe[timesteps_flat])."""
    N = timesteps_flat.shape[0]
    _, D = pe.shape

    # Tiny op — tell XLA so it schedules/overlaps it correctly instead of serializing.
    cost = pl.CostEstimate(
        flops=4 * N * D * D,                  # two (N,D)x(D,D) GEMMs
        transcendentals=N * D,                # exp inside sigmoid
        bytes_accessed=(2 * D * D + 2 * D + 2 * N * D) * 4,
    )

    grid_spec = pltpu.PrefetchScalarGridSpec(
        num_scalar_prefetch=1,                # timesteps -> SMEM, available to kernel body
        grid=(1,),
        in_specs=[
            pl.BlockSpec(memory_space=pl.ANY),                 # pe stays in place; manual gather
            pl.BlockSpec((2, D, D), lambda i, ts: (0, 0, 0)),  # stacked weights (resident)
            pl.BlockSpec((2, 1, D), lambda i, ts: (0, 0, 0)),  # stacked biases
        ],
        out_specs=pl.BlockSpec((N, D), lambda i, ts: (0, 0)),
        scratch_shapes=[
            pltpu.VMEM((N, D), jnp.float32),                   # gathered pe rows
            pltpu.SemaphoreType.DMA((N,)),                     # one sem per row DMA
        ],
    )

    return pl.pallas_call(
        _timestep_embed_kernel,
        out_shape=jax.ShapeDtypeStruct((N, D), jnp.float32),
        grid_spec=grid_spec,
        compiler_params=pltpu.CompilerParams(
            dimension_semantics=("arbitrary",),
            vmem_limit_bytes=16 * 1024 * 1024,                 # tiny usage; safe v5e/v6e/v7x
        ),
        cost_estimate=cost,
    )(timesteps_flat, pe, w_stack, b_stack)
    # TODO(synk): if latent_dim grows beyond ~512, add K/N weight tiling with an f32 VMEM
    # accumulator + pl.when init/finalize, and store weights in bf16 for v6e/v7x MXU rates.


# ----------------------------------------------------------------------------
# Module glue (parameter construction, pe table, reshape/permute)
# ----------------------------------------------------------------------------
def make_positional_encoding(d_model, max_len=5000):
    position = jnp.arange(0, max_len, dtype=jnp.float32)[:, None]              # (max_len, 1)
    div_term = jnp.exp(
        jnp.arange(0, d_model, 2, dtype=jnp.float32) * (-math.log(10000.0) / d_model)
    )                                                                           # (ceil(D/2),)
    n_cos = d_model // 2                                                        # robust for odd D
    pe = jnp.zeros((max_len, d_model), dtype=jnp.float32)
    pe = pe.at[:, 0::2].set(jnp.sin(position * div_term))
    pe = pe.at[:, 1::2].set(jnp.cos(position * div_term[:n_cos]))
    return pe


def init_timestep_embedder_params(key, latent_dim):
    D = latent_dim
    k1, k2, k3, k4 = jax.random.split(key, 4)
    scale = 1.0 / math.sqrt(D)
    # Weights stored (in, out) so the kernel does x @ W + b (equivalent to torch Linear).
    w1 = jax.random.uniform(k1, (D, D), jnp.float32, -scale, scale)
    b1 = jax.random.uniform(k2, (1, D), jnp.float32, -scale, scale)
    w2 = jax.random.uniform(k3, (D, D), jnp.float32, -scale, scale)
    b2 = jax.random.uniform(k4, (1, D), jnp.float32, -scale, scale)
    # Stacked form consumed by the kernel (done once at init, not per step).
    return {
        "w1": w1, "b1": b1, "w2": w2, "b2": b2,
        "w_stack": jnp.stack([w1, w2], axis=0),        # (2, D, D)
        "b_stack": jnp.stack([b1, b2], axis=0),        # (2, 1, D)
    }


def timestep_embedder_forward(params, pe, timesteps):
    """timesteps: int32 (B, S) (typically S=1). Returns (S, B, D) — matches .permute(1, 0, 2)."""
    B, S = timesteps.shape
    D = pe.shape[1]
    flat = timesteps.reshape(-1).astype(jnp.int32)                              # (B*S,)
    # NOTE: indices must be < max_len (the in-kernel gather is a raw DMA).
    emb = time_embed_fused(flat, pe, params["w_stack"], params["b_stack"])      # (B*S, D)
    return jnp.transpose(emb.reshape(B, S, D), (1, 0, 2))                       # (S, B, D)


# ----------------------------------------------------------------------------
# Pure-JAX reference (for sanity)
# ----------------------------------------------------------------------------
def _reference_forward(params, pe, timesteps):
    x = pe[timesteps]                                                           # (B, S, D)
    h = x @ params["w1"] + params["b1"]
    h = h * jax.nn.sigmoid(h)
    o = h @ params["w2"] + params["b2"]
    return jnp.transpose(o, (1, 0, 2))                                          # (S, B, D)


if __name__ == "__main__":
    latent_dim = 32
    batch = 2
    max_len = 5000

    key = jax.random.PRNGKey(0)
    kp, kt = jax.random.split(key)

    params = init_timestep_embedder_params(kp, latent_dim)
    pe = make_positional_encoding(latent_dim, max_len=max_len)

    # timesteps: (B, 1) int32 diffusion step indices (as used by the original module)
    timesteps = jax.random.randint(kt, (batch, 1), 0, max_len, dtype=jnp.int32)

    out = timestep_embedder_forward(params, pe, timesteps)
    out = jax.block_until_ready(out)

    ref = jax.block_until_ready(_reference_forward(params, pe, timesteps))
    assert out.shape == (1, batch, latent_dim), out.shape
    assert jnp.allclose(out, ref, atol=1e-5, rtol=1e-5), "mismatch vs reference"

    print("KERNEL_OK")
</pallas_src>

<mosaic_0001>
module attributes {stable_mosaic.version = 11 : i64} {
  func.func @_timestep_embed_kernel(%arg0: i32, %arg1: memref<2xi32, #tpu.memory_space<smem>>, %arg2: memref<5000x32xf32, #tpu.memory_space<any>>, %arg3: memref<2x32x32xf32, #tpu.memory_space<vmem>>, %arg4: memref<2x1x32xf32, #tpu.memory_space<vmem>>, %arg5: memref<2x32xf32, #tpu.memory_space<vmem>>, %arg6: memref<2x32xf32, #tpu.memory_space<vmem>>, %arg7: memref<2x!tpu.dma_semaphore, #tpu.memory_space<semaphore_mem>>) attributes {dimension_semantics = [#tpu.dimension_semantics<arbitrary>], iteration_bounds = array<i64: 1>, scalar_prefetch = 1 : i64, scratch_operands = 2 : i64, tpu.core_type = #tpu.core_type<tc>, window_params = [{}, {pipeline_mode = #tpu.pipeline_mode<synchronous>, transform_indices = @transform_1, window_bounds = array<i64: 2, 32, 32>}, {pipeline_mode = #tpu.pipeline_mode<synchronous>, transform_indices = @transform_2, window_bounds = array<i64: 2, 1, 32>}, {pipeline_mode = #tpu.pipeline_mode<synchronous>, transform_indices = @transform_3, window_bounds = array<i64: 2, 32>}]} {
    %c0 = arith.constant 0 : index
    %0 = memref.load %arg1[%c0] : memref<2xi32, #tpu.memory_space<smem>>
    %c0_i32 = arith.constant 0 : i32
    %c0_i32_0 = arith.constant 0 : i32
    %1 = tpu.memref_slice %arg2[%0, %c0_i32_0] : memref<5000x32xf32, #tpu.memory_space<any>> -> memref<1x32xf32, #tpu.memory_space<any>>
    %c0_i32_1 = arith.constant 0 : i32
    %c0_i32_2 = arith.constant 0 : i32
    %2 = tpu.memref_slice %arg6[%c0_i32_1, %c0_i32_2] : memref<2x32xf32, #tpu.memory_space<vmem>> -> memref<1x32xf32, #tpu.memory_space<vmem>>
    %3 = tpu.memref_slice %arg7[%c0_i32] : memref<2x!tpu.dma_semaphore, #tpu.memory_space<semaphore_mem>> -> memref<1x!tpu.dma_semaphore, #tpu.memory_space<semaphore_mem>>
    %4 = tpu.memref_squeeze %3 : memref<1x!tpu.dma_semaphore, #tpu.memory_space<semaphore_mem>> -> memref<!tpu.dma_semaphore, #tpu.memory_space<semaphore_mem>>
    tpu.enqueue_dma source(%1 : memref<1x32xf32, #tpu.memory_space<any>>) target(%2 : memref<1x32xf32, #tpu.memory_space<vmem>>) target_semaphore(%4 : memref<!tpu.dma_semaphore, #tpu.memory_space<semaphore_mem>>)
    %c1 = arith.constant 1 : index
    %5 = memref.load %arg1[%c1] : memref<2xi32, #tpu.memory_space<smem>>
    %c1_i32 = arith.constant 1 : i32
    %c0_i32_3 = arith.constant 0 : i32
    %6 = tpu.memref_slice %arg2[%5, %c0_i32_3] : memref<5000x32xf32, #tpu.memory_space<any>> -> memref<1x32xf32, #tpu.memory_space<any>>
    %c1_i32_4 = arith.constant 1 : i32
    %c0_i32_5 = arith.constant 0 : i32
    %7 = tpu.memref_slice %arg6[%c1_i32_4, %c0_i32_5] : memref<2x32xf32, #tpu.memory_space<vmem>> -> memref<1x32xf32, #tpu.memory_space<vmem>>
    %8 = tpu.memref_slice %arg7[%c1_i32] : memref<2x!tpu.dma_semaphore, #tpu.memory_space<semaphore_mem>> -> memref<1x!tpu.dma_semaphore, #tpu.memory_space<semaphore_mem>>
    %9 = tpu.memref_squeeze %8 : memref<1x!tpu.dma_semaphore, #tpu.memory_space<semaphore_mem>> -> memref<!tpu.dma_semaphore, #tpu.memory_space<semaphore_mem>>
    tpu.enqueue_dma source(%6 : memref<1x32xf32, #tpu.memory_space<any>>) target(%7 : memref<1x32xf32, #tpu.memory_space<vmem>>) target_semaphore(%9 : memref<!tpu.dma_semaphore, #tpu.memory_space<semaphore_mem>>)
    %c0_i32_6 = arith.constant 0 : i32
    %c0_i32_7 = arith.constant 0 : i32
    %10 = tpu.memref_slice %arg2[%0, %c0_i32_7] : memref<5000x32xf32, #tpu.memory_space<any>> -> memref<1x32xf32, #tpu.memory_space<any>>
    %c0_i32_8 = arith.constant 0 : i32
    %c0_i32_9 = arith.constant 0 : i32
    %11 = tpu.memref_slice %arg6[%c0_i32_8, %c0_i32_9] : memref<2x32xf32, #tpu.memory_space<vmem>> -> memref<1x32xf32, #tpu.memory_space<vmem>>
    %12 = tpu.memref_slice %arg7[%c0_i32_6] : memref<2x!tpu.dma_semaphore, #tpu.memory_space<semaphore_mem>> -> memref<1x!tpu.dma_semaphore, #tpu.memory_space<semaphore_mem>>
    %13 = tpu.memref_squeeze %12 : memref<1x!tpu.dma_semaphore, #tpu.memory_space<semaphore_mem>> -> memref<!tpu.dma_semaphore, #tpu.memory_space<semaphore_mem>>
    tpu.wait_dma2 semaphore(%13 : memref<!tpu.dma_semaphore, #tpu.memory_space<semaphore_mem>>) src(%10 : memref<1x32xf32, #tpu.memory_space<any>>) dst(%11 : memref<1x32xf32, #tpu.memory_space<vmem>>)
    %c1_i32_10 = arith.constant 1 : i32
    %c0_i32_11 = arith.constant 0 : i32
    %14 = tpu.memref_slice %arg2[%5, %c0_i32_11] : memref<5000x32xf32, #tpu.memory_space<any>> -> memref<1x32xf32, #tpu.memory_space<any>>
    %c1_i32_12 = arith.constant 1 : i32
    %c0_i32_13 = arith.constant 0 : i32
    %15 = tpu.memref_slice %arg6[%c1_i32_12, %c0_i32_13] : memref<2x32xf32, #tpu.memory_space<vmem>> -> memref<1x32xf32, #tpu.memory_space<vmem>>
    %16 = tpu.memref_slice %arg7[%c1_i32_10] : memref<2x!tpu.dma_semaphore, #tpu.memory_space<semaphore_mem>> -> memref<1x!tpu.dma_semaphore, #tpu.memory_space<semaphore_mem>>
    %17 = tpu.memref_squeeze %16 : memref<1x!tpu.dma_semaphore, #tpu.memory_space<semaphore_mem>> -> memref<!tpu.dma_semaphore, #tpu.memory_space<semaphore_mem>>
    tpu.wait_dma2 semaphore(%17 : memref<!tpu.dma_semaphore, #tpu.memory_space<semaphore_mem>>) src(%14 : memref<1x32xf32, #tpu.memory_space<any>>) dst(%15 : memref<1x32xf32, #tpu.memory_space<vmem>>)
    %c0_14 = arith.constant 0 : index
    %c0_15 = arith.constant 0 : index
    %18 = vector.load %arg6[%c0_14, %c0_15] : memref<2x32xf32, #tpu.memory_space<vmem>>, vector<2x32xf32>
    %c0_16 = arith.constant 0 : index
    %c0_17 = arith.constant 0 : index
    %c0_18 = arith.constant 0 : index
    %19 = vector.load %arg3[%c0_16, %c0_17, %c0_18] : memref<2x32x32xf32, #tpu.memory_space<vmem>>, vector<2x32x32xf32>
    %c0_19 = arith.constant 0 : index
    %c0_20 = arith.constant 0 : index
    %c0_21 = arith.constant 0 : index
    %20 = vector.load %arg4[%c0_19, %c0_20, %c0_21] : memref<2x1x32xf32, #tpu.memory_space<vmem>>, vector<2x1x32xf32>
    %21 = vector.extract_strided_slice %19 {offsets = [0, 0, 0], sizes = [1, 32, 32], strides = [1, 1, 1]} : vector<2x32x32xf32> to vector<1x32x32xf32>
    %22 = vector.shape_cast %21 : vector<1x32x32xf32> to vector<32x32xf32>
    %cst = arith.constant dense<0.000000e+00> : vector<2x32xf32>
    %23 = tpu.matmul %18, %22, %cst {dimension_numbers = #tpu.dot_dimension_numbers<[1], [0], [0], [1], [0, 0, 1, 1], [], []>} : vector<2x32xf32>, vector<32x32xf32>, vector<2x32xf32> -> vector<2x32xf32>
    %24 = vector.extract_strided_slice %20 {offsets = [0, 0, 0], sizes = [1, 1, 32], strides = [1, 1, 1]} : vector<2x1x32xf32> to vector<1x1x32xf32>
    %25 = vector.shape_cast %24 : vector<1x1x32xf32> to vector<1x32xf32>
    %26 = vector.broadcast %25 : vector<1x32xf32> to vector<2x32xf32>
    %27 = arith.addf %23, %26 : vector<2x32xf32>
    %28 = arith.negf %27 : vector<2x32xf32>
    %29 = math.exp %28 : vector<2x32xf32>
    %cst_22 = arith.constant 1.000000e+00 : f32
    %30 = vector.broadcast %cst_22 : f32 to vector<2x32xf32>
    %31 = arith.addf %30, %29 : vector<2x32xf32>
    %32 = arith.divf %30, %31 : vector<2x32xf32>
    %33 = arith.mulf %27, %32 : vector<2x32xf32>
    %34 = vector.extract_strided_slice %19 {offsets = [1, 0, 0], sizes = [1, 32, 32], strides = [1, 1, 1]} : vector<2x32x32xf32> to vector<1x32x32xf32>
    %35 = vector.shape_cast %34 : vector<1x32x32xf32> to vector<32x32xf32>
    %cst_23 = arith.constant dense<0.000000e+00> : vector<2x32xf32>
    %36 = tpu.matmul %33, %35, %cst_23 {dimension_numbers = #tpu.dot_dimension_numbers<[1], [0], [0], [1], [0, 0, 1, 1], [], []>} : vector<2x32xf32>, vector<32x32xf32>, vector<2x32xf32> -> vector<2x32xf32>
    %37 = vector.extract_strided_slice %20 {offsets = [1, 0, 0], sizes = [1, 1, 32], strides = [1, 1, 1]} : vector<2x1x32xf32> to vector<1x1x32xf32>
    %38 = vector.shape_cast %37 : vector<1x1x32xf32> to vector<1x32xf32>
    %39 = vector.broadcast %38 : vector<1x32xf32> to vector<2x32xf32>
    %40 = arith.addf %36, %39 : vector<2x32xf32>
    %c0_24 = arith.constant 0 : index
    %c0_25 = arith.constant 0 : index
    %41 = vector.load %arg5[%c0_24, %c0_25] : memref<2x32xf32, #tpu.memory_space<vmem>>, vector<2x32xf32>
    tpu.vector_store %arg5[%c0_24, %c0_25], %40 {strides = array<i32>} : memref<2x32xf32, #tpu.memory_space<vmem>>, vector<2x32xf32>,
    return
  }
  func.func @transform_1(%arg0: i32, %arg1: memref<2xi32, #tpu.memory_space<smem>>) -> (i32, i32, i32) {
    %c0_i32 = arith.constant 0 : i32
    %c0_i32_0 = arith.constant 0 : i32
    %c0_i32_1 = arith.constant 0 : i32
    %c0_i32_2 = arith.constant 0 : i32
    return %c0_i32, %c0_i32_0, %c0_i32_1 : i32, i32, i32
  }
  func.func @transform_2(%arg0: i32, %arg1: memref<2xi32, #tpu.memory_space<smem>>) -> (i32, i32, i32) {
    %c0_i32 = arith.constant 0 : i32
    %c0_i32_0 = arith.constant 0 : i32
    %c0_i32_1 = arith.constant 0 : i32
    %c0_i32_2 = arith.constant 0 : i32
    return %c0_i32, %c0_i32_0, %c0_i32_1 : i32, i32, i32
  }
  func.func @transform_3(%arg0: i32, %arg1: memref<2xi32, #tpu.memory_space<smem>>) -> (i32, i32) {
    %c0_i32 = arith.constant 0 : i32
    %c0_i32_0 = arith.constant 0 : i32
    %c0_i32_1 = arith.constant 0 : i32
    return %c0_i32, %c0_i32_0 : i32, i32
  }
}

</mosaic_0001>

<bundles_post_ra>
// kernel: tpu_custom_call.1
= control target key start
LH: loop header
LB: loop body
LE: loop exit
PB: predicated region body
PF: predicated region fallthrough
CT: control target
= control target key end

     0   :  { %s534_s0 = inlined_call_operand.vmem [shape: s32[2], index: 0, kind: input, shape index: {}]   ;;  %s535_s1 = inlined_call_operand.vmem [shape: f32[5000,32], index: 1, kind: input, shape index: {}]   ;;  %s536_s2 = inlined_call_operand.vmem [shape: f32[2,32,32], index: 2, kind: input, shape index: {}]   ;;  %s537_s3 = inlined_call_operand.vmem [shape: f32[2,1,32], index: 3, kind: input, shape index: {}]   ;;  %s538_s4 = inlined_call_operand.hbm [shape: f32[2,32], index: 4, kind: output, shape index: {}]  }
   0x1   :  { %s9_s17 = sshll.u32 %s534_s0, 4  ;;  %s10_s17 = int_to_ptr.vmem [resolvable:$true] %s9_s17 }
   0x2   :  { %s409_s18 = scalar_lea.vmem %s10_s17, 16  ;;  %p414_p1 = scmp.lt.s32.totalorder %s10_s17, %s10_s17 }
   0x3   :  { %p410_p0 = scmp.ne.s32.totalorder %s10_s17, %s409_s18  ;;  %p415_p2 = scmp.lt.s32.totalorder %s409_s18, %s409_s18 }
   0x5   :  { %p416_p3 = por %p415_p2, %p414_p1 }
   0x7   :  { %p417_p4 = pnand %p416_p3, %p410_p0 }
   0x9   :  { %420 = shalt.err (!%p417_p4)  }
   0xa   :  { %s451_s19 = smov [#allocation5]  }
   0xb   :  { %12 = dma.vmem_to_smem %s10_s17, 16, %s451_s19, [#allocation4] }
   0xc   :  { %443 = dma.done.wait [#allocation4], 16 }
   0xd   :  { %444 = vsyncadd [#allocation4], 4294967280 }
   0xe   :  { %14 = sfence }
   0xf   :  { %15 = vsyncpa [#allocation7], 0  ;;  %s20_s20 = sld [smem:[#allocation5]] }
  0x15   :  { %s21_s23 = scalar_lea.vmem %s535_s1, %s20_s20 }
  0x16   :  { %v39_v0 = vld [vmem:[%s21_s23] sm:$0x1] }
  0x17   :  { %40 = vst [vmem:[#allocation2] sm:$0x1] %v39_v0 }
  0x18   :  { %65 = vsyncadd [#allocation3], 16  ;;  %s348_s0 = sld [smem:[#allocation5 + $0x1]] }
  0x1e   :  { %s67_s26 = scalar_lea.vmem %s535_s1, %s348_s0 }
  0x1f   :  { %v87_v1 = vld [vmem:[%s67_s26] sm:$0x1] }
  0x20   :  { %88 = vst [vmem:[#allocation2 + $0x1] sm:$0x1] %v87_v1 }
  0x21   :  { %113 = vsyncadd [#allocation3 + $0x1], 16 }
  0x22   :  { %445 = dma.done.wait [#allocation3], 16 }
  0x23   :  { %446 = vsyncadd [#allocation3], 4294967280 }
  0x24   :  { %447 = dma.done.wait [#allocation3 + $0x1], 16 }
  0x25   :  { %448 = vsyncadd [#allocation3 + $0x1], 4294967280  ;;  %v452_v2 = vmov 0.0|0.0   ;;  %vm453_vm0 = vmmov 0   ;;  %v454_v3 = vmov 0.0   ;;  %v120_v4 = vld [vmem:[%s536_s2] sm:$0xff] }
  0x26   :  { %388 = vmatprep.subr.bf16.mxu0 %v452_v2  ;;  %374 = vmatprep.mubr.msk.f32.mxu0 %vm453_vm0, %v454_v3  ;;  %v121_v5 = vld [vmem:[%s536_s2 + $0x8] sm:$0xff]  ;;  %v122_v6 = vld [vmem:[%s536_s2 + $0x10] sm:$0xff]  ;;  %v123_v8 = vld [vmem:[%s536_s2 + $0x18] sm:$0xff]  ;;  %vm136_vm1 = vcmask 261120   ;;  %s455_s19 = smov [#allocation6]   ;;  %vm296_vm2 = vcmask 254976  }
  0x27   :  { %394 = vmatprep.subr.bf16.mxu1 %v452_v2  ;;  %385 = vmatprep.mubr.msk.f32.mxu1 %vm453_vm0, %v454_v3  ;;  %v389_v7 = vpack.c.bf16 %v121_v5, %v120_v4  ;;  %v392_v9 = vpack.c.bf16 %v123_v8, %v122_v6  ;;  %v119_v10 = vld [vmem:[#allocation2] sm:$0x3]  ;;  %v125_v12 = vld [vmem:[%s536_s2 + $0x28] sm:$0xff]  ;;  %v126_v14 = vld [vmem:[%s536_s2 + $0x30] sm:$0xff]  ;;  %s304_s20 = sshll.u32 %s455_s19, 4  ;;  %s305_s20 = int_to_ptr.vmem [resolvable:$true] %s304_s20 }
  0x28   :  { %v124_v11 = vld [vmem:[%s536_s2 + $0x20] sm:$0xff]  ;;  %v127_v15 = vld [vmem:[%s536_s2 + $0x38] sm:$0xff]  ;;  %s421_s21 = scalar_lea.vmem %s305_s20, 32  ;;  %p426_p6 = scmp.lt.s32.totalorder %s305_s20, %s305_s20 }
  0x29   :  { %390 = vmatpush3.bf16.msra.mxu0 %v389_v7  ;;  %v395_v13 = vpack.c.bf16 %v125_v12, %v124_v11  ;;  %v398_v16 = vpack.c.bf16 %v127_v15, %v126_v14  ;;  %v349_v17 = vld [vmem:[%s537_s3] ss:$0 sm:$0xff]  ;;  %v352_v26 = vld [vmem:[%s537_s3 + $0x1] ss:$0 sm:$0xff]  ;;  %p422_p5 = scmp.ne.s32.totalorder %s305_s20, %s421_s21  ;;  %p427_p7 = scmp.lt.s32.totalorder %s421_s21, %s421_s21 }
  0x2a   :  { %391 = vmatprep.subr.bf16.mxu0 %v452_v2 }
  0x2b   :  { %396 = vmatpush3.bf16.msra.mxu1 %v395_v13  ;;  %p428_p8 = por %p427_p7, %p426_p6 }
  0x2c   :  { %397 = vmatprep.subr.bf16.mxu1 %v452_v2 }
  0x2d   :  { %393 = vmatpush3.bf16.msra.mxu0 %v392_v9  ;;  %p429_p9 = pnand %p428_p8, %p422_p5 }
  0x2f   :  { %399 = vmatpush3.bf16.msra.mxu1 %v398_v16 }
  0x30   :  { %375 = vmatmul.mubr.msk.f32.vlgmr.msra.gmra.mrb[0].mxu0 %vm136_vm1, %v119_v10 }
 0x103   :  { %v206_v18 = vpop.f32.mrb[0].mxu0 }
 0x104   :  { %v207_v19 = vadd.f32 %v349_v17, %v206_v18  ;;  %v376_v20 = vpop.f32.mrb[1].mxu0 }
 0x106   :  { %v351_v21 = vmul.f32 -1.442695, %v207_v19 }
 0x108   :  { %405 = vpow2.f32 %v351_v21 }
 0x112   :  { %v406_v22 = vpop.eup %405 }
 0x113   :  { %v213_v23 = vadd.f32 1.0, %v406_v22 }
 0x115   :  { %407 = vrcp.f32 %v213_v23 }
 0x11f   :  { %v408_v24 = vpop.eup %407 }
 0x120   :  { %v216_v25 = vmul.f32 %v408_v24, %v207_v19 }
 0x122   :  { %386 = vmatmul.mubr.msk.f32.vlgmr.msra.gmra.mrb[0].mxu1 %vm136_vm1, %v216_v25 }
 0x1f5   :  { %v292_v27 = vpop.f32.mrb[0].mxu1 }
 0x1f6   :  { %v293_v28 = vadd.f32 %v352_v26, %v292_v27  ;;  %v387_v29 = vpop.f32.mrb[1].mxu1 }
 0x1f8   :  { %297 = vst.msk [vmem:[#allocation6] sm:$0x3] %vm296_vm2, %v293_v28 }
 0x1f9   :  { %432 = shalt.err (!%p429_p9)
}
 0x1fa   :  { %s433_s0 = scalar_lea.hbm %s538_s4, 32 }
 0x1fb   :  { %p434_p10 = scmp.ne.s32.totalorder %s538_s4, %s433_s0  ;;  %p437_p11 = scmp.lt.u32.totalorder %s433_s0, %s538_s4 }
 0x1fd   :  { %p439_p12 = pnand %p437_p11, %p434_p10 }
 0x1ff   :  { %442 = shalt.err (!%p439_p12)
}
 0x200   :  { %307 = dma.vmem_to_hbm [thread:$0]  %s305_s20, 32, %s538_s4, [#allocation7]  }
 0x201   :  { %449 = dma.done.wait [#allocation7], 32  }
 0x202   :  { %450 = vsyncadd [#allocation7], 4294967264 }
 0x203   :  { %311 = vsyncpa [#allocation7], 1 }
 0x204   :  { %312 = vsyncmov [#allocation3] }
 0x207   :  { %s313_s29 = vpop.sfrf %312 }
 0x208   :  { %p354_p13 = scmp.ne.s32.totalorder %s313_s29, 0 }
 0x20a   :  { %317 = shalt.err (%p354_p13)  }
 0x20b   :  { %319 = vsyncmov [#allocation3 + $0x1] }
 0x20e   :  { %s320_s1 = vpop.sfrf %319 }
 0x20f   :  { %p355_p0 = scmp.ne.s32.totalorder %s320_s1, 0 }
 0x211   :  { %324 = shalt.err (%p355_p0)  }

</bundles_post_ra>
